<compile_context>
chip_gen: v6e
topology: v6e:2x2x1
jax: 0.10.0
libtpu: 0.0.40
codegen_flags: <defaults>
</compile_context>

<pallas_src>
import functools

import jax
import jax.numpy as jnp
from jax.experimental import pallas as pl
from jax.experimental.pallas import tpu as pltpu


# ---------------- Pass 1: streaming mean over T -> (B, C) ----------------

def _mean_kernel(x_ref, mean_ref, acc_ref, *, inv_t):
    # x_ref: (B_blk, C, T_tile); mean_ref, acc_ref: (B_blk, C) f32
    t = pl.program_id(1)

    @pl.when(t == 0)
    def _():
        acc_ref[...] = jnp.zeros_like(acc_ref)

    acc_ref[...] += jnp.sum(x_ref[...].astype(jnp.float32), axis=-1)

    @pl.when(t == pl.num_programs(1) - 1)
    def _():
        mean_ref[...] = acc_ref[...] * inv_t


# ---------------- Pass 2: streaming apply o = s*x + s ----------------

def _apply_kernel(s_ref, x_ref, o_ref):
    # s_ref: (B_blk, C) f32; x_ref / o_ref: (B_blk, C, T_tile)
    # Keep the hot loop at exactly mul+add per element (v5e has 1 vst slot).
    s = s_ref[...].astype(x_ref.dtype)[:, :, None]   # (B_blk, C, 1)
    x = x_ref[...]
    o_ref[...] = (s * x + s).astype(o_ref.dtype)


# ---------------- Tiling / wrapper ----------------

def _choose_tiles(B, C, T, itemsize, budget_bytes=24 * 1024 * 1024):
    """Pick (batch_block, t_tile) with divisibility + VMEM-budget constraints."""
    b_blk = 8 if (B % 8 == 0) else B
    # Largest 128-multiple T tile dividing T whose double-buffered in+out
    # x-blocks fit the budget; fall back to full T for small / odd T.
    t_tile = T
    if T % 128 == 0:
        t_tile = 128
        for cand in (2048, 1024, 512, 256, 128):
            if T % cand == 0 and 4 * b_blk * C * cand * itemsize <= budget_bytes:
                t_tile = cand
                break
    return b_blk, t_tile


def fms_forward(x, weight, bias):
    """x: (B, C, T); weight: (C, C) PyTorch Linear layout (out, in); bias: (C,)."""
    B, C, T = x.shape
    itemsize = jnp.dtype(x.dtype).itemsize
    b_blk, t_tile = _choose_tiles(B, C, T, itemsize)
    vmem_limit = 48 * 1024 * 1024

    # ---- Pass 1: mean over T (Pallas, reduction axis last / "arbitrary") ----
    mean = pl.pallas_call(
        functools.partial(_mean_kernel, inv_t=1.0 / T),
        out_shape=jax.ShapeDtypeStruct((B, C), jnp.float32),
        grid_spec=pltpu.PrefetchScalarGridSpec(
            num_scalar_prefetch=0,
            grid=(B // b_blk, T // t_tile),
            in_specs=[
                pl.BlockSpec((b_blk, C, t_tile), lambda b, t: (b, 0, t)),
            ],
            out_specs=pl.BlockSpec((b_blk, C), lambda b, t: (b, 0)),
            scratch_shapes=[pltpu.VMEM((b_blk, C), jnp.float32)],
        ),
        compiler_params=pltpu.CompilerParams(
            dimension_semantics=("parallel", "arbitrary"),
            vmem_limit_bytes=vmem_limit,
        ),
    )(x)

    # ---- Hoisted tiny linear + sigmoid: one matmul for all batches (XLA) ----
    s = jax.nn.sigmoid(
        jnp.dot(mean, weight.astype(jnp.float32).T,
                preferred_element_type=jnp.float32)
        + bias.astype(jnp.float32)[None, :]
    )  # (B, C) f32

    # ---- Pass 2: o = s*x + s (Pallas, fully parallel streaming pass) ----
    out = pl.pallas_call(
        _apply_kernel,
        out_shape=jax.ShapeDtypeStruct((B, C, T), x.dtype),
        grid_spec=pltpu.PrefetchScalarGridSpec(
            num_scalar_prefetch=0,
            grid=(B // b_blk, T // t_tile),
            in_specs=[
                pl.BlockSpec((b_blk, C), lambda b, t: (b, 0)),          # s
                pl.BlockSpec((b_blk, C, t_tile), lambda b, t: (b, 0, t)),  # x
            ],
            out_specs=pl.BlockSpec((b_blk, C, t_tile), lambda b, t: (b, 0, t)),
        ),
        compiler_params=pltpu.CompilerParams(
            dimension_semantics=("parallel", "parallel"),
            vmem_limit_bytes=vmem_limit,
        ),
    )(s, x)
    return out


def fms_reference(x, weight, bias):
    mean = jnp.mean(x, axis=-1)                      # (B, C)
    s = jax.nn.sigmoid(mean @ weight.T + bias)       # (B, C)
    s = s[:, :, None]                                # (B, C, 1)
    return s * x + s


if __name__ == "__main__":
    B, C, T = 2, 4, 16

    key = jax.random.PRNGKey(0)
    kx, kw, kb = jax.random.split(key, 3)

    x = jax.random.normal(kx, (B, C, T), dtype=jnp.float32)
    # Deterministic init mimicking nn.Linear(C, C): uniform(-1/sqrt(C), 1/sqrt(C)).
    bound = 1.0 / jnp.sqrt(jnp.float32(C))
    weight = jax.random.uniform(kw, (C, C), dtype=jnp.float32,
                                minval=-bound, maxval=bound)
    bias = jax.random.uniform(kb, (C,), dtype=jnp.float32,
                              minval=-bound, maxval=bound)

    out = jax.block_until_ready(fms_forward(x, weight, bias))
    ref = fms_reference(x, weight, bias)

    assert out.shape == (B, C, T)
    assert jnp.allclose(out, ref, atol=1e-5, rtol=1e-5), "mismatch vs reference"

    print("KERNEL_OK")
</pallas_src>

<mosaic_0001>
module attributes {stable_mosaic.version = 11 : i64} {
  func.func @_mean_kernel(%arg0: i32, %arg1: i32, %arg2: memref<2x4x16xf32, #tpu.memory_space<vmem>>, %arg3: memref<2x4xf32, #tpu.memory_space<vmem>>, %arg4: memref<2x4xf32, #tpu.memory_space<vmem>>) attributes {dimension_semantics = [#tpu.dimension_semantics<parallel>, #tpu.dimension_semantics<arbitrary>], iteration_bounds = array<i64: 1, 1>, scalar_prefetch = 0 : i64, scratch_operands = 1 : i64, tpu.core_type = #tpu.core_type<tc>, window_params = [{transform_indices = @transform_0, window_bounds = array<i64: 2, 4, 16>}, {transform_indices = @transform_1, window_bounds = array<i64: 2, 4>}]} {
    %c0_i32 = arith.constant 0 : i32
    %0 = arith.cmpi eq, %arg1, %c0_i32 : i32
    %1 = arith.extui %0 : i1 to i32
    %c0_i32_0 = arith.constant 0 : i32
    %2 = arith.cmpi ne, %1, %c0_i32_0 : i32
    scf.if %2 {
      %cst_9 = arith.constant 0.000000e+00 : f32
      %11 = vector.broadcast %cst_9 : f32 to vector<2x4xf32>
      %c0_10 = arith.constant 0 : index
      %c0_11 = arith.constant 0 : index
      %12 = vector.load %arg4[%c0_10, %c0_11] : memref<2x4xf32, #tpu.memory_space<vmem>>, vector<2x4xf32>
      tpu.vector_store %arg4[%c0_10, %c0_11], %11 {strides = array<i32>} : memref<2x4xf32, #tpu.memory_space<vmem>>, vector<2x4xf32>,
    } else {
    }
    %c0 = arith.constant 0 : index
    %c0_1 = arith.constant 0 : index
    %3 = vector.load %arg4[%c0, %c0_1] : memref<2x4xf32, #tpu.memory_space<vmem>>, vector<2x4xf32>
    %c0_2 = arith.constant 0 : index
    %c0_3 = arith.constant 0 : index
    %c0_4 = arith.constant 0 : index
    %4 = vector.load %arg2[%c0_2, %c0_3, %c0_4] : memref<2x4x16xf32, #tpu.memory_space<vmem>>, vector<2x4x16xf32>
    %cst = arith.constant dense<0.000000e+00> : vector<2x4xf32>
    %5 = vector.multi_reduction <add>, %4, %cst [2] : vector<2x4x16xf32> to vector<2x4xf32>
    %6 = arith.addf %3, %5 : vector<2x4xf32>
    %c0_5 = arith.constant 0 : index
    %c0_6 = arith.constant 0 : index
    %7 = vector.load %arg4[%c0_5, %c0_6] : memref<2x4xf32, #tpu.memory_space<vmem>>, vector<2x4xf32>
    tpu.vector_store %arg4[%c0_5, %c0_6], %6 {strides = array<i32>} : memref<2x4xf32, #tpu.memory_space<vmem>>, vector<2x4xf32>,
    %c0_i32_7 = arith.constant 0 : i32
    %8 = arith.cmpi eq, %arg1, %c0_i32_7 : i32
    %9 = arith.extui %8 : i1 to i32
    %c0_i32_8 = arith.constant 0 : i32
    %10 = arith.cmpi ne, %9, %c0_i32_8 : i32
    scf.if %10 {
      %c0_9 = arith.constant 0 : index
      %c0_10 = arith.constant 0 : index
      %11 = vector.load %arg4[%c0_9, %c0_10] : memref<2x4xf32, #tpu.memory_space<vmem>>, vector<2x4xf32>
      %cst_11 = arith.constant 6.250000e-02 : f32
      %12 = vector.broadcast %cst_11 : f32 to vector<2x4xf32>
      %13 = arith.mulf %11, %12 : vector<2x4xf32>
      %c0_12 = arith.constant 0 : index
      %c0_13 = arith.constant 0 : index
      %14 = vector.load %arg3[%c0_12, %c0_13] : memref<2x4xf32, #tpu.memory_space<vmem>>, vector<2x4xf32>
      tpu.vector_store %arg3[%c0_12, %c0_13], %13 {strides = array<i32>} : memref<2x4xf32, #tpu.memory_space<vmem>>, vector<2x4xf32>,
    } else {
    }
    return
  }
  func.func @transform_0(%arg0: i32, %arg1: i32) -> (i32, i32, i32) {
    %c0_i32 = arith.constant 0 : i32
    %c0_i32_0 = arith.constant 0 : i32
    return %arg0, %c0_i32, %arg1 : i32, i32, i32
  }
  func.func @transform_1(%arg0: i32, %arg1: i32) -> (i32, i32) {
    %c0_i32 = arith.constant 0 : i32
    %c0_i32_0 = arith.constant 0 : i32
    return %arg0, %c0_i32 : i32, i32
  }
}

</mosaic_0001>

<bundles_post_ra>
// kernel: tpu_custom_call.1
= control target key start
LH: loop header
LB: loop body
LE: loop exit
PB: predicated region body
PF: predicated region fallthrough
CT: control target
= control target key end

     0   :  { %6 = vsyncpa [#allocation4], 0  ;;  %s151_s0 = inlined_call_operand.hbm [shape: f32[2,4,16], index: 0, kind: input, shape index: {}]   ;;  %s152_s1 = inlined_call_operand.hbm [shape: f32[2,4], index: 1, kind: output, shape index: {}]  }
   0x1   :  { %7 = vsyncpa [#allocation5], 0  ;;  %s127_s6 = smov [#allocation3]  }
   0x2   :  { %s13_s7 = sshll.u32 %s127_s6, 4  ;;  %s14_s7 = int_to_ptr.vmem [resolvable:$true] %s13_s7 }
   0x3   :  { %s91_s8 = scalar_lea.vmem %s14_s7, 128  ;;  %p96_p1 = scmp.lt.s32.totalorder %s14_s7, %s14_s7 }
   0x4   :  { %p92_p0 = scmp.ne.s32.totalorder %s14_s7, %s91_s8  ;;  %p97_p2 = scmp.lt.s32.totalorder %s91_s8, %s91_s8 }
   0x6   :  { %p98_p3 = por %p97_p2, %p96_p1 }
   0x8   :  { %p99_p4 = pnand %p98_p3, %p92_p0 }
   0xa   :  { %102 = shalt.err (!%p99_p4)
}
   0xb   :  { %s128_s9 = smov 64   ;;  %s129_s10 = smov 4  }
   0xc   :  { %19 = dma.hbm_to_vmem [thread:$0]  %s151_s0, 128, %s14_s7, [#allocation4], %s128_s9, %s128_s9, %s129_s10  }
   0xd   :  { %123 = dma.done.wait [#allocation4], 128  }
   0xe   :  { %124 = vsyncadd [#allocation4], 4294967168  ;;  %vm32_vm0 = vcmask 125952   ;;  %v30_v0 = vld [vmem:[#allocation3] sm:$0xf]  ;;  %vm27_vm1 = vcmask 25600   ;;  %v41_v5 = vlaneseq }
   0xf   :  { %v31_v1 = vld [vmem:[#allocation3 + $0x4] sm:$0xf]  ;;  %v33_v2 = vsel %vm32_vm0, %v30_v0, 0.0  ;;  %v130_v4 = vmov 0.0   ;;  %vm51_vm2 = vcmask 1041409   ;;  %s131_s0 = smov [#allocation6]  }
  0x10   :  { %34 = vadd.xlane.f32.xlu0 %v33_v2  ;;  %v36_v3 = vsel %vm32_vm0, %v31_v1, 0.0  ;;  %28 = vst.msk [vmem:[#allocation2] sm:$0x3] %vm27_vm1, %v130_v4  ;;  %v42_v6 = vand.u32 127, %v41_v5  ;;  %v44_v7 = vshrl.u32 %v41_v5, 7  ;;  %s69_s13 = sshll.u32 %s131_s0, 4  ;;  %s70_s13 = int_to_ptr.vmem [resolvable:$true] %s69_s13 }
  0x11   :  { %s103_s14 = scalar_lea.vmem %s70_s13, 32  ;;  %p108_p6 = scmp.lt.s32.totalorder %s70_s13, %s70_s13 }
  0x12   :  { %v45_v9 = vsub.s32 %v42_v6, %v44_v7  ;;  %p104_p5 = scmp.ne.s32.totalorder %s70_s13, %s103_s14  ;;  %p109_p7 = scmp.lt.s32.totalorder %s103_s14, %s103_s14 }
  0x14   :  { %37 = vadd.xlane.f32.xlu0 %v36_v3  ;;  %p110_p8 = por %p109_p7, %p108_p6 }
  0x16   :  { %p111_p9 = pnand %p110_p8, %p104_p5 }
  0x17   :  { %v29_v13 = vld [vmem:[#allocation2] sm:$0x3] }
  0x99   :  { %v35_v8 = vpop.xlane.xlu0 %34 }
  0x9a   :  { %v46_v11 = vrot.slane %v35_v8, %v45_v9 }
  0x9d   :  { %v38_v10 = vpop.xlane.xlu0 %37 }
  0x9e   :  { %v50_v12 = vrot.slane %v38_v10, %v45_v9 }
  0xa0   :  { %v52_v14 = vsel %vm51_vm2, %v50_v12, %v46_v11 }
  0xa1   :  { %v54_v15 = vadd.f32 %v52_v14, %v29_v13 }
  0xa3   :  { %56 = vst.msk [vmem:[#allocation2] sm:$0x3] %vm27_vm1, %v54_v15 }
  0xaa   :  { %v60_v16 = vld [vmem:[#allocation2] sm:$0x3] }
  0xab   :  { %v61_v17 = vmul.f32 0.0625, %v60_v16 }
  0xad   :  { %62 = vst.msk [vmem:[#allocation6] sm:$0x3] %vm27_vm1, %v61_v17 }
  0xae   :  { %114 = shalt.err (!%p111_p9)
}
  0xaf   :  { %72 = dma.vmem_to_hbm [thread:$0]  %s70_s13, 32, %s152_s1, [#allocation5]  }
  0xb0   :  { %125 = dma.done.wait [#allocation5], 32  }
  0xb1   :  { %126 = vsyncadd [#allocation5], 4294967264 }
  0xb2   :  { %76 = vsyncpa [#allocation4], 1 }
  0xb3   :  { %77 = vsyncpa [#allocation5], 1 }

</bundles_post_ra>
